<compile_context>
chip_gen: v6e
topology: v6e:2x2x1
jax: 0.10.0
libtpu: 0.0.40
codegen_flags: <defaults>
</compile_context>

<pallas_src>
import functools

import jax
import jax.numpy as jnp
from jax.experimental import pallas as pl
from jax.experimental.pallas import tpu as pltpu


def _round_up(n, m):
    return (n + m - 1) // m * m


# ---------------------------------------------------------------------------
# Pallas kernel: y = x @ W + b, then per-token LayerNorm (lane-dense, vectorized)
# ---------------------------------------------------------------------------
def _image_proj_ln_kernel(x_ref, w_ref, params_ref, avg_ref, o_ref, *, eps, matmul_dtype):
    # x_ref      : (tile_m, d_in)   f32 (cast to matmul dtype in vregs — no wrapper pass)
    # w_ref      : (d_in, d_out)    matmul dtype, resident across the row grid
    # params_ref : (8, d_out)       f32; row 0 = bias, row 1 = gamma, row 2 = beta
    # avg_ref    : (d_out, d_out)   f32 block-diagonal averaging matrix
    #                               (1/cross_dim within a token's block, else 0)
    # o_ref      : (tile_m, d_out)  output (full-width lane-dense store)
    x = x_ref[...].astype(matmul_dtype)
    y = jnp.dot(x, w_ref[...], preferred_element_type=jnp.float32)   # MXU, f32 accum

    bias = params_ref[0:1, :]
    gamma = params_ref[1:2, :]
    beta = params_ref[2:3, :]
    y = y + bias                                                      # one full-width FMA

    # Per-token LayerNorm without slicing at a 64-lane boundary: segment means/variances
    # come from lane-dense dots with the block-diagonal averaging matrix, already
    # broadcast across each token's lanes. The two dots are independent (mu from y,
    # ms from y*y) so MXU issue/pop overlap on the v5e/v6e result FIFO.
    avg = avg_ref[...]
    yy = y * y
    mu = jnp.dot(y, avg, preferred_element_type=jnp.float32)          # per-token mean
    ms = jnp.dot(yy, avg, preferred_element_type=jnp.float32)         # per-token E[y^2]
    var = jnp.maximum(ms - mu * mu, 0.0)                              # guard cancellation

    out = (y - mu) * jax.lax.rsqrt(var + eps) * gamma + beta
    o_ref[...] = out.astype(o_ref.dtype)                              # single lane-dense store


def image_proj_model(x, w, ln_params, avg, *, eps=1e-5, matmul_dtype=jnp.bfloat16,
                     max_tile_m=1024, out_dtype=jnp.float32):
    """x: (M, d_in) f32 -> (M, d_out).  w: (d_in, d_out).  ln_params: (8, d_out).  avg: (d_out, d_out)."""
    M, d_in = x.shape
    d_in_w, d_out = w.shape
    assert d_in_w == d_in, (d_in_w, d_in)
    assert ln_params.shape == (8, d_out), ln_params.shape
    assert avg.shape == (d_out, d_out), avg.shape

    # Big row tiles (mem-bound), but keep >=2 grid steps when M > 8 so the "parallel"
    # row axis can shard across v7x's two TensorCores. Ragged last block is masked.
    tile_m = max(8, min(max_tile_m, _round_up(pl.cdiv(M, 2), 8)))
    grid = (pl.cdiv(M, tile_m),)

    # Weight is tiny (d_in x d_out) and stays resident; casting it here is negligible
    # next to x traffic. x itself is NOT padded or cast in the wrapper.
    w_mm = w if w.dtype == jnp.dtype(matmul_dtype) else w.astype(matmul_dtype)

    cost = pl.CostEstimate(
        flops=int(2 * M * d_in * d_out + 4 * M * d_out * d_out),
        transcendentals=int(M * d_out),
        bytes_accessed=int(x.size * x.dtype.itemsize
                           + w_mm.size * jnp.dtype(matmul_dtype).itemsize
                           + 4 * (ln_params.size + avg.size)
                           + M * d_out * jnp.dtype(out_dtype).itemsize),
    )

    return pl.pallas_call(
        functools.partial(_image_proj_ln_kernel, eps=eps, matmul_dtype=matmul_dtype),
        out_shape=jax.ShapeDtypeStruct((M, d_out), out_dtype),
        grid=grid,
        in_specs=[
            # Full-width contraction block (== array dim, so 448 is legal); rows tiled.
            pl.BlockSpec((tile_m, d_in), lambda i: (i, 0)),
            pl.BlockSpec((d_in, d_out), lambda i: (0, 0)),    # weight resident
            pl.BlockSpec((8, d_out), lambda i: (0, 0)),       # bias/gamma/beta packed
            pl.BlockSpec((d_out, d_out), lambda i: (0, 0)),   # averaging matrix resident
        ],
        out_specs=pl.BlockSpec((tile_m, d_out), lambda i: (i, 0)),
        compiler_params=pltpu.CompilerParams(
            dimension_semantics=("parallel",)),   # lets v7x split row tiles across TCs
        cost_estimate=cost,
    )(x, w_mm, ln_params, avg)


# ---------------------------------------------------------------------------
# SDNetwork.forward (Pallas-backed where it matters)
# ---------------------------------------------------------------------------
class SDNetworkPallas:
    def __init__(self, *, cross_attention_dim=64, clip_embed_channels=7,
                 clip_embed_spatial=8, num_tokens=2, seed=0,
                 matmul_dtype=jnp.bfloat16):
        self.num_tokens = num_tokens
        self.cross_attention_dim = cross_attention_dim
        self.matmul_dtype = matmul_dtype
        # proj_dim = C * H * W of the image-embed feature map (analogue of (4+3)*64**2)
        self.proj_dim = clip_embed_channels * clip_embed_spatial * clip_embed_spatial
        d_out = num_tokens * cross_attention_dim
        self.d_out = d_out

        key = jax.random.PRNGKey(seed)
        (k_w,) = jax.random.split(key, 1)
        # torch Linear stores (out, in); we keep (in, out) so the kernel does x @ W.
        self.proj_w = 0.02 * jax.random.normal(
            k_w, (self.proj_dim, d_out), dtype=jnp.float32)
        self.proj_b = jnp.zeros((d_out,), dtype=jnp.float32)
        self.ln_gamma = jnp.ones((cross_attention_dim,), dtype=jnp.float32)
        self.ln_beta = jnp.zeros((cross_attention_dim,), dtype=jnp.float32)

        # --- one-time precompute for the kernel ---------------------------------
        # Pack bias / per-token-tiled gamma / beta into a single (8, d_out) f32 operand
        # (one DMA instead of three tiny ones per grid step).
        gamma_full = jnp.tile(self.ln_gamma, num_tokens)
        beta_full = jnp.tile(self.ln_beta, num_tokens)
        params = jnp.zeros((8, d_out), dtype=jnp.float32)
        params = params.at[0].set(self.proj_b)
        params = params.at[1].set(gamma_full)
        params = params.at[2].set(beta_full)
        self.ln_params = params

        # Block-diagonal averaging matrix: 1/cross_dim within a token's block.
        idx = jnp.arange(d_out)
        same_tok = (idx[:, None] // cross_attention_dim) == (idx[None, :] // cross_attention_dim)
        self.avg = jnp.where(same_tok, 1.0 / cross_attention_dim, 0.0).astype(jnp.float32)

        # TODO(synk): VAE, SDXL UNet, CLIP image/text encoders, DDIM scheduler, tokenizers
        #             and the optional use_downsampling_layers Conv2d stack are frozen
        #             pretrained / off-by-default modules; not reproduced here.

    def forward(self, noisy_latents, timesteps, added_cond_kwargs, image_embeds,
                matmul_dtype=None):
        del noisy_latents, timesteps, added_cond_kwargs  # consumed by the (skipped) UNet
        if matmul_dtype is None:
            matmul_dtype = self.matmul_dtype
        # image_embeds: (bs*seq, C, H, W), NCHW like PyTorch.
        seq = 2
        bs = image_embeds.shape[0] // seq
        hidden_state_dim = (image_embeds.shape[-1] * image_embeds.shape[-2]
                            * image_embeds.shape[-3])
        x = image_embeds.reshape(-1, hidden_state_dim)          # == torch .view

        ip_tokens = image_proj_model(
            x, self.proj_w, self.ln_params, self.avg, matmul_dtype=matmul_dtype)

        ip_tokens = ip_tokens.reshape(bs, seq * self.num_tokens, -1)
        encoder_hidden_states = ip_tokens

        # TODO(synk): noise_pred = self.unet(noisy_latents, timesteps,
        #             encoder_hidden_states, added_cond_kwargs=...) — pretrained SDXL
        #             UNet, not reproducible as a synthetic Pallas kernel.
        return encoder_hidden_states


# ---------------------------------------------------------------------------
# Reference (plain JAX) for correctness check
# ---------------------------------------------------------------------------
def _reference(net, image_embeds, seq=2, matmul_dtype=None):
    bs = image_embeds.shape[0] // seq
    x = image_embeds.reshape(image_embeds.shape[0], -1)
    w = net.proj_w
    if matmul_dtype is not None and jnp.dtype(matmul_dtype) != jnp.dtype(jnp.float32):
        y = jnp.dot(x.astype(matmul_dtype), w.astype(matmul_dtype),
                    preferred_element_type=jnp.float32)
    else:
        y = jnp.dot(x, w, preferred_element_type=jnp.float32,
                    precision=jax.lax.Precision.HIGHEST)
    y = y + net.proj_b
    y = y.reshape(-1, net.num_tokens, net.cross_attention_dim)
    mu = y.mean(-1, keepdims=True)
    var = ((y - mu) ** 2).mean(-1, keepdims=True)
    y = (y - mu) * jax.lax.rsqrt(var + 1e-5) * net.ln_gamma + net.ln_beta
    return y.reshape(bs, seq * net.num_tokens, net.cross_attention_dim)


if __name__ == "__main__":
    key = jax.random.PRNGKey(0)
    k1, k2, k3, k4, k5 = jax.random.split(key, 5)

    bs, seq = 2, 2
    # small shapes consistent with the forward pass
    noisy_latents = jax.random.normal(k1, (bs, 4, 16, 16), dtype=jnp.float32)
    timesteps = jnp.array([10, 500], dtype=jnp.int32)
    image_embeds = jax.random.normal(k2, (bs * seq, 7, 8, 8), dtype=jnp.float32)
    added_cond_kwargs = {
        "text_embeds": jax.random.normal(k3, (bs, 32), dtype=jnp.float32),
        "time_ids": jax.random.normal(k4, (bs, 6), dtype=jnp.float32),
    }

    net = SDNetworkPallas(cross_attention_dim=64, clip_embed_channels=7,
                          clip_embed_spatial=8, num_tokens=2, seed=0,
                          matmul_dtype=jnp.bfloat16)

    ref_f32 = _reference(net, image_embeds, seq=seq)

    # 1) f32-operand path: matches the (torch-faithful) f32 reference.
    out_f32 = net.forward(noisy_latents, timesteps, added_cond_kwargs, image_embeds,
                          matmul_dtype=jnp.float32)
    out_f32 = jax.block_until_ready(out_f32)
    assert out_f32.shape == (bs, seq * net.num_tokens, net.cross_attention_dim), out_f32.shape
    assert jnp.allclose(out_f32, ref_f32, atol=1e-3, rtol=1e-3), \
        float(jnp.max(jnp.abs(out_f32 - ref_f32)))

    # 2) bf16-operand path (v6e/v7x MXU peak): match a same-cast reference tightly and
    #    the pure-f32 reference within the bf16-rounding bound.
    out_bf16 = net.forward(noisy_latents, timesteps, added_cond_kwargs, image_embeds)
    out_bf16 = jax.block_until_ready(out_bf16)
    ref_bf16 = _reference(net, image_embeds, seq=seq, matmul_dtype=jnp.bfloat16)
    assert jnp.allclose(out_bf16, ref_bf16, atol=2e-3, rtol=2e-3), \
        float(jnp.max(jnp.abs(out_bf16 - ref_bf16)))
    assert jnp.allclose(out_bf16, ref_f32, atol=7.5e-2), \
        float(jnp.max(jnp.abs(out_bf16 - ref_f32)))

    # 3) Larger ragged batch: exercises the multi-tile grid and the masked last block
    #    (M=100 rows -> tile_m=56, grid=2, second block partially out of range).
    image_embeds2 = jax.random.normal(k5, (100, 7, 8, 8), dtype=jnp.float32)
    out2 = net.forward(noisy_latents, timesteps, added_cond_kwargs, image_embeds2)
    out2 = jax.block_until_ready(out2)
    ref2 = _reference(net, image_embeds2, seq=seq, matmul_dtype=jnp.bfloat16)
    assert out2.shape == ref2.shape, (out2.shape, ref2.shape)
    assert jnp.allclose(out2, ref2, atol=2e-3, rtol=2e-3), \
        float(jnp.max(jnp.abs(out2 - ref2)))

    print("KERNEL_OK")
</pallas_src>

<mosaic_0001>
module attributes {stable_mosaic.version = 11 : i64} {
  func.func @_image_proj_ln_kernel(%arg0: i32, %arg1: memref<8x448xf32, #tpu.memory_space<vmem>>, %arg2: memref<448x128xf32, #tpu.memory_space<vmem>>, %arg3: memref<8x128xf32, #tpu.memory_space<vmem>>, %arg4: memref<128x128xf32, #tpu.memory_space<vmem>>, %arg5: memref<8x128xf32, #tpu.memory_space<vmem>>) attributes {dimension_semantics = [#tpu.dimension_semantics<parallel>], iteration_bounds = array<i64: 1>, scalar_prefetch = 0 : i64, scratch_operands = 0 : i64, tpu.core_type = #tpu.core_type<tc>, window_params = [{transform_indices = @transform_0, window_bounds = array<i64: 8, 448>}, {pipeline_mode = #tpu.pipeline_mode<synchronous>, transform_indices = @transform_1, window_bounds = array<i64: 448, 128>}, {pipeline_mode = #tpu.pipeline_mode<synchronous>, transform_indices = @transform_2, window_bounds = array<i64: 8, 128>}, {pipeline_mode = #tpu.pipeline_mode<synchronous>, transform_indices = @transform_3, window_bounds = array<i64: 128, 128>}, {transform_indices = @transform_4, window_bounds = array<i64: 8, 128>}]} {
    %c0 = arith.constant 0 : index
    %c0_0 = arith.constant 0 : index
    %0 = vector.load %arg1[%c0, %c0_0] : memref<8x448xf32, #tpu.memory_space<vmem>>, vector<8x448xf32>
    %c0_1 = arith.constant 0 : index
    %c0_2 = arith.constant 0 : index
    %1 = vector.load %arg2[%c0_1, %c0_2] : memref<448x128xf32, #tpu.memory_space<vmem>>, vector<448x128xf32>
    %cst = arith.constant dense<0.000000e+00> : vector<8x128xf32>
    %2 = tpu.matmul %0, %1, %cst {dimension_numbers = #tpu.dot_dimension_numbers<[1], [0], [0], [1], [0, 0, 1, 1], [], []>} : vector<8x448xf32>, vector<448x128xf32>, vector<8x128xf32> -> vector<8x128xf32>
    %c0_3 = arith.constant 0 : index
    %c0_4 = arith.constant 0 : index
    %3 = vector.load %arg3[%c0_3, %c0_4] : memref<8x128xf32, #tpu.memory_space<vmem>>, vector<1x128xf32>
    %c1 = arith.constant 1 : index
    %c0_5 = arith.constant 0 : index
    %4 = vector.load %arg3[%c1, %c0_5] : memref<8x128xf32, #tpu.memory_space<vmem>>, vector<1x128xf32>
    %c2 = arith.constant 2 : index
    %c0_6 = arith.constant 0 : index
    %5 = vector.load %arg3[%c2, %c0_6] : memref<8x128xf32, #tpu.memory_space<vmem>>, vector<1x128xf32>
    %6 = vector.broadcast %3 : vector<1x128xf32> to vector<8x128xf32>
    %7 = arith.addf %2, %6 : vector<8x128xf32>
    %c0_7 = arith.constant 0 : index
    %c0_8 = arith.constant 0 : index
    %8 = vector.load %arg4[%c0_7, %c0_8] : memref<128x128xf32, #tpu.memory_space<vmem>>, vector<128x128xf32>
    %9 = arith.mulf %7, %7 : vector<8x128xf32>
    %cst_9 = arith.constant dense<0.000000e+00> : vector<8x128xf32>
    %10 = tpu.matmul %7, %8, %cst_9 {dimension_numbers = #tpu.dot_dimension_numbers<[1], [0], [0], [1], [0, 0, 1, 1], [], []>} : vector<8x128xf32>, vector<128x128xf32>, vector<8x128xf32> -> vector<8x128xf32>
    %cst_10 = arith.constant dense<0.000000e+00> : vector<8x128xf32>
    %11 = tpu.matmul %9, %8, %cst_10 {dimension_numbers = #tpu.dot_dimension_numbers<[1], [0], [0], [1], [0, 0, 1, 1], [], []>} : vector<8x128xf32>, vector<128x128xf32>, vector<8x128xf32> -> vector<8x128xf32>
    %12 = arith.mulf %10, %10 : vector<8x128xf32>
    %13 = arith.subf %11, %12 : vector<8x128xf32>
    %cst_11 = arith.constant 0.000000e+00 : f32
    %14 = vector.broadcast %cst_11 : f32 to vector<8x128xf32>
    %15 = arith.maximumf %13, %14 : vector<8x128xf32>
    %16 = arith.subf %7, %10 : vector<8x128xf32>
    %cst_12 = arith.constant 9.99999974E-6 : f32
    %17 = vector.broadcast %cst_12 : f32 to vector<8x128xf32>
    %18 = arith.addf %15, %17 : vector<8x128xf32>
    %19 = math.rsqrt %18 : vector<8x128xf32>
    %20 = arith.mulf %16, %19 : vector<8x128xf32>
    %21 = vector.broadcast %4 : vector<1x128xf32> to vector<8x128xf32>
    %22 = arith.mulf %20, %21 : vector<8x128xf32>
    %23 = vector.broadcast %5 : vector<1x128xf32> to vector<8x128xf32>
    %24 = arith.addf %22, %23 : vector<8x128xf32>
    %c0_13 = arith.constant 0 : index
    %c0_14 = arith.constant 0 : index
    %25 = vector.load %arg5[%c0_13, %c0_14] : memref<8x128xf32, #tpu.memory_space<vmem>>, vector<8x128xf32>
    tpu.vector_store %arg5[%c0_13, %c0_14], %24 {strides = array<i32>} : memref<8x128xf32, #tpu.memory_space<vmem>>, vector<8x128xf32>,
    return
  }
  func.func @transform_0(%arg0: i32) -> (i32, i32) {
    %c0_i32 = arith.constant 0 : i32
    %c0_i32_0 = arith.constant 0 : i32
    return %arg0, %c0_i32 : i32, i32
  }
  func.func @transform_1(%arg0: i32) -> (i32, i32) {
    %c0_i32 = arith.constant 0 : i32
    %c0_i32_0 = arith.constant 0 : i32
    %c0_i32_1 = arith.constant 0 : i32
    return %c0_i32, %c0_i32_0 : i32, i32
  }
  func.func @transform_2(%arg0: i32) -> (i32, i32) {
    %c0_i32 = arith.constant 0 : i32
    %c0_i32_0 = arith.constant 0 : i32
    %c0_i32_1 = arith.constant 0 : i32
    return %c0_i32, %c0_i32_0 : i32, i32
  }
  func.func @transform_3(%arg0: i32) -> (i32, i32) {
    %c0_i32 = arith.constant 0 : i32
    %c0_i32_0 = arith.constant 0 : i32
    %c0_i32_1 = arith.constant 0 : i32
    return %c0_i32, %c0_i32_0 : i32, i32
  }
  func.func @transform_4(%arg0: i32) -> (i32, i32) {
    %c0_i32 = arith.constant 0 : i32
    %c0_i32_0 = arith.constant 0 : i32
    return %arg0, %c0_i32 : i32, i32
  }
}

</mosaic_0001>

<bundles_post_ra>
// kernel: tpu_custom_call.1
= control target key start
LH: loop header
LB: loop body
LE: loop exit
PB: predicated region body
PF: predicated region fallthrough
CT: control target
= control target key end

     0   :  { %9 = vsyncpa [#allocation3], 0  ;;  %s875_s0 = inlined_call_operand.hbm [shape: f32[4,448], index: 0, kind: input, shape index: {}]   ;;  %s876_s1 = inlined_call_operand.hbm [shape: f32[448,128], index: 1, kind: input, shape index: {}]   ;;  %s877_s2 = inlined_call_operand.hbm [shape: f32[8,128], index: 2, kind: input, shape index: {}]   ;;  %s878_s3 = inlined_call_operand.hbm [shape: f32[128,128], index: 3, kind: input, shape index: {}]   ;;  %s879_s4 = inlined_call_operand.hbm [shape: f32[4,128], index: 4, kind: output, shape index: {}]  }
   0x1   :  { %10 = vsyncpa [#allocation6], 0 }
   0x2   :  { %11 = vsyncpa [#allocation9], 0 }
   0x3   :  { %12 = vsyncpa [#allocation4], 0 }
   0x4   :  { %17 = vsyncadd [#allocation3], 256  ;;  %s758_s15 = smov [#allocation5]  }
   0x5   :  { %s30_s16 = sshll.u32 %s758_s15, 4  ;;  %s31_s16 = int_to_ptr.vmem [resolvable:$true] %s30_s16 }
   0x6   :  { %s658_s17 = scalar_lea.vmem %s31_s16, 7168  ;;  %p663_p1 = scmp.lt.s32.totalorder %s31_s16, %s31_s16 }
   0x7   :  { %p659_p0 = scmp.ne.s32.totalorder %s31_s16, %s658_s17  ;;  %p664_p2 = scmp.lt.s32.totalorder %s658_s17, %s658_s17 }
   0x9   :  { %p665_p3 = por %p664_p2, %p663_p1 }
   0xb   :  { %p666_p4 = pnand %p665_p3, %p659_p0 }
   0xd   :  { %669 = shalt.err (!%p666_p4)
}
   0xe   :  { %s759_s18 = smov 128   ;;  %s760_s19 = smov 8  }
   0xf   :  { %36 = dma.hbm_to_vmem [thread:$0]  %s876_s1, 7168, %s31_s16, [#allocation6], %s759_s18, %s759_s18, %s760_s19  }
  0x10   :  { %s761_s22 = smov [#allocation2]  }
  0x11   :  { %s18_s23 = sshll.u32 %s761_s22, 4  ;;  %s19_s23 = int_to_ptr.vmem [resolvable:$true] %s18_s23 }
  0x12   :  { %s678_s24 = scalar_lea.vmem %s19_s23, 256  ;;  %s682_s25 = scalar_lea.vmem %s19_s23, 512 }
  0x13   :  { %p679_p5 = scmp.ne.s32.totalorder %s19_s23, %s678_s24  ;;  %p683_p6 = scmp.lt.s32.totalorder %s19_s23, %s19_s23 }
  0x14   :  { %p684_p7 = scmp.lt.s32.totalorder %s682_s25, %s678_s24 }
  0x16   :  { %p685_p8 = por %p684_p7, %p683_p6 }
  0x18   :  { %p686_p9 = pnand %p685_p8, %p679_p5 }
  0x1a   :  { %689 = shalt.err (!%p686_p9)
}
  0x1b   :  { %s762_s26 = smov 256   ;;  %s763_s27 = smov 16  }
  0x1c   :  { %24 = dma.hbm_to_vmem [thread:$0]  %s875_s0, 256, %s19_s23, [#allocation3], %s762_s26, %s762_s26, %s763_s27  }
  0x1d   :  { %s764_s30 = smov [#allocation7]   ;;  %s765_s1 = smov [#allocation8]  }
  0x1e   :  { %s43_s5 = sshll.u32 %s764_s30, 4  ;;  %s52_s6 = sshll.u32 %s765_s1, 4  ;;  %s44_s5 = int_to_ptr.vmem [resolvable:$true] %s43_s5  ;;  %s53_s6 = int_to_ptr.vmem [resolvable:$true] %s52_s6 }
  0x1f   :  { %s698_s7 = scalar_lea.vmem %s44_s5, 128  ;;  %p703_p11 = scmp.lt.s32.totalorder %s44_s5, %s44_s5 }
  0x20   :  { %p699_p10 = scmp.ne.s32.totalorder %s44_s5, %s698_s7  ;;  %p704_p12 = scmp.lt.s32.totalorder %s698_s7, %s698_s7 }
  0x22   :  { %p705_p13 = por %p704_p12, %p703_p11 }
  0x24   :  { %p706_p0 = pnand %p705_p13, %p699_p10 }
  0x26   :  { %709 = shalt.err (!%p706_p0)
}
  0x27   :  { %46 = dma.hbm_to_vmem [thread:$0]  %s877_s2, 128, %s44_s5, [#allocation6]  }
  0x28   :  { %s718_s10 = scalar_lea.vmem %s53_s6, 2048  ;;  %p723_p2 = scmp.lt.s32.totalorder %s53_s6, %s53_s6 }
  0x29   :  { %p719_p1 = scmp.ne.s32.totalorder %s53_s6, %s718_s10  ;;  %p724_p3 = scmp.lt.s32.totalorder %s718_s10, %s718_s10 }
  0x2b   :  { %p725_p4 = por %p724_p3, %p723_p2 }
  0x2d   :  { %p726_p5 = pnand %p725_p4, %p719_p1 }
  0x2f   :  { %729 = shalt.err (!%p726_p5)
}
  0x30   :  { %58 = dma.hbm_to_vmem [thread:$0]  %s878_s3, 2048, %s53_s6, [#allocation9], %s759_s18, %s759_s18, %s760_s19  }
  0x31   :  { %750 = dma.done.wait [#allocation3], 512  }
  0x32   :  { %751 = vsyncadd [#allocation3], 4294966784 }
  0x33   :  { %752 = dma.done.wait [#allocation6], 7296  }
  0x34   :  { %753 = vsyncadd [#allocation6], 4294960000 }
  0x35   :  { %754 = dma.done.wait [#allocation9], 2048  }
  0x36   :  { %755 = vsyncadd [#allocation9], 4294965248  ;;  %v766_v0 = vmov 0.0   ;;  %v122_v1 = vld [vmem:[#allocation5 + $0x178] sm:$0xff]  ;;  %v121_v2 = vld [vmem:[#allocation5 + $0x170] sm:$0xff]  ;;  %vm149_vm0 = vcmask 523264  }
  0x37   :  { %222 = vmatprep.subr.mxu1 %v766_v0  ;;  %v106_v3 = vld [vmem:[#allocation5 + $0xf8] sm:$0xff]  ;;  %v120_v5 = vld [vmem:[#allocation5 + $0x168] sm:$0xff]  ;;  %v105_v6 = vld [vmem:[#allocation5 + $0xf0] sm:$0xff]  ;;  %vm767_vm1 = vmmov 0  }
  0x38   :  { %223 = vmatpush1.msra.mxu1 %v122_v1  ;;  %v90_v4 = vld [vmem:[#allocation5 + $0x78] sm:$0xff]  ;;  %490 = vmatprep.subr.mxu0 %v106_v3  ;;  %v89_v7 = vld [vmem:[#allocation5 + $0x70] sm:$0xff]  ;;  %v104_v8 = vld [vmem:[#allocation5 + $0xe8] sm:$0xff] }
  0x39   :  { %224 = vmatprep.subr.mxu1 %v766_v0  ;;  %491 = vmatpush3.msra.mxu0 %v90_v4  ;;  %v119_v9 = vld [vmem:[#allocation5 + $0x160] sm:$0xff]  ;;  %v88_v10 = vld [vmem:[#allocation5 + $0x68] sm:$0xff]  ;;  %v118_v12 = vld [vmem:[#allocation5 + $0x158] sm:$0xff] }
  0x3a   :  { %225 = vmatpush1.msra.mxu1 %v121_v2  ;;  %492 = vmatprep.subr.mxu0 %v105_v6  ;;  %v103_v11 = vld [vmem:[#allocation5 + $0xe0] sm:$0xff]  ;;  %v102_v14 = vld [vmem:[#allocation5 + $0xd8] sm:$0xff]  ;;  %v117_v15 = vld [vmem:[#allocation5 + $0x150] sm:$0xff] }
  0x3b   :  { %226 = vmatprep.subr.mxu1 %v766_v0  ;;  %493 = vmatpush3.msra.mxu0 %v89_v7  ;;  %v87_v13 = vld [vmem:[#allocation5 + $0x60] sm:$0xff]  ;;  %v86_v16 = vld [vmem:[#allocation5 + $0x58] sm:$0xff]  ;;  %v101_v17 = vld [vmem:[#allocation5 + $0xd0] sm:$0xff] }
  0x3c   :  { %227 = vmatpush1.msra.mxu1 %v120_v5  ;;  %494 = vmatprep.subr.mxu0 %v104_v8  ;;  %v116_v18 = vld [vmem:[#allocation5 + $0x148] sm:$0xff]  ;;  %v85_v19 = vld [vmem:[#allocation5 + $0x50] sm:$0xff]  ;;  %v115_v21 = vld [vmem:[#allocation5 + $0x140] sm:$0xff] }
  0x3d   :  { %228 = vmatprep.subr.mxu1 %v766_v0  ;;  %495 = vmatpush3.msra.mxu0 %v88_v10  ;;  %v100_v20 = vld [vmem:[#allocation5 + $0xc8] sm:$0xff]  ;;  %v99_v23 = vld [vmem:[#allocation5 + $0xc0] sm:$0xff]  ;;  %v114_v24 = vld [vmem:[#allocation5 + $0x138] sm:$0xff] }
  0x3e   :  { %229 = vmatpush1.msra.mxu1 %v119_v9  ;;  %496 = vmatprep.subr.mxu0 %v103_v11  ;;  %v84_v22 = vld [vmem:[#allocation5 + $0x48] sm:$0xff]  ;;  %v83_v25 = vld [vmem:[#allocation5 + $0x40] sm:$0xff]  ;;  %v98_v26 = vld [vmem:[#allocation5 + $0xb8] sm:$0xff] }
  0x3f   :  { %230 = vmatprep.subr.mxu1 %v766_v0  ;;  %497 = vmatpush3.msra.mxu0 %v87_v13  ;;  %v113_v27 = vld [vmem:[#allocation5 + $0x130] sm:$0xff]  ;;  %v82_v28 = vld [vmem:[#allocation5 + $0x38] sm:$0xff]  ;;  %v112_v30 = vld [vmem:[#allocation5 + $0x128] sm:$0xff] }
  0x40   :  { %231 = vmatpush1.msra.mxu1 %v118_v12  ;;  %498 = vmatprep.subr.mxu0 %v102_v14  ;;  %v97_v29 = vld [vmem:[#allocation5 + $0xb0] sm:$0xff]  ;;  %v111_v32 = vld [vmem:[#allocation5 + $0x120] sm:$0xff]  ;;  %v96_v33 = vld [vmem:[#allocation5 + $0xa8] sm:$0xff] }
  0x41   :  { %232 = vmatprep.subr.mxu1 %v766_v0  ;;  %499 = vmatpush3.msra.mxu0 %v86_v16  ;;  %v81_v31 = vld [vmem:[#allocation5 + $0x30] sm:$0xff]  ;;  %v80_v34 = vld [vmem:[#allocation5 + $0x28] sm:$0xff]  ;;  %v95_v35 = vld [vmem:[#allocation5 + $0xa0] sm:$0xff] }
  0x42   :  { %233 = vmatpush1.msra.mxu1 %v117_v15  ;;  %500 = vmatprep.subr.mxu0 %v101_v17  ;;  %v110_v36 = vld [vmem:[#allocation5 + $0x118] sm:$0xff]  ;;  %v79_v37 = vld [vmem:[#allocation5 + $0x20] sm:$0xff]  ;;  %v109_v39 = vld [vmem:[#allocation5 + $0x110] sm:$0xff] }
  0x43   :  { %234 = vmatprep.subr.mxu1 %v766_v0  ;;  %501 = vmatpush3.msra.mxu0 %v85_v19  ;;  %v94_v38 = vld [vmem:[#allocation5 + $0x98] sm:$0xff]  ;;  %v93_v41 = vld [vmem:[#allocation5 + $0x90] sm:$0xff]  ;;  %v108_v42 = vld [vmem:[#allocation5 + $0x108] sm:$0xff] }
  0x44   :  { %235 = vmatpush1.msra.mxu1 %v116_v18  ;;  %502 = vmatprep.subr.mxu0 %v100_v20  ;;  %v78_v40 = vld [vmem:[#allocation5 + $0x18] sm:$0xff]  ;;  %v77_v43 = vld [vmem:[#allocation5 + $0x10] sm:$0xff]  ;;  %v92_v44 = vld [vmem:[#allocation5 + $0x88] sm:$0xff] }
  0x45   :  { %236 = vmatprep.subr.mxu1 %v766_v0  ;;  %503 = vmatpush3.msra.mxu0 %v84_v22  ;;  %v107_v45 = vld [vmem:[#allocation5 + $0x100] sm:$0xff]  ;;  %v76_v46 = vld [vmem:[#allocation5 + $0x8] sm:$0xff]  ;;  %v130_v48 = vld [vmem:[#allocation5 + $0x1b8] sm:$0xff] }
  0x46   :  { %237 = vmatpush1.msra.mxu1 %v115_v21  ;;  %504 = vmatprep.subr.mxu0 %v99_v23  ;;  %v91_v47 = vld [vmem:[#allocation5 + $0x80] sm:$0xff]  ;;  %v129_v52 = vld [vmem:[#allocation5 + $0x1b0] sm:$0xff]  ;;  %v647_v53 = vld [vmem:[#allocation2 + $0xc] ss:$16 sps:$4 sm:$0xff]  }
  0x47   :  { %238 = vmatprep.subr.mxu1 %v766_v0  ;;  %505 = vmatpush3.msra.mxu0 %v83_v25  ;;  %v75_v49 = vld [vmem:[#allocation5] sm:$0xff]  ;;  %v128_v54 = vld [vmem:[#allocation5 + $0x1a8] sm:$0xff]  ;;  %v306_v57 = vld [vmem:[#allocation8 + $0x70] sm:$0xff] }
  0x48   :  { %239 = vmatpush1.msra.mxu1 %v114_v24  ;;  %506 = vmatprep.subr.mxu0 %v98_v26  ;;  %v644_v50 = vld [vmem:[#allocation2 + $0x4] ss:$16 sps:$4 sm:$0xff]   ;;  %v642_v51 = vld [vmem:[#allocation2] ss:$16 sps:$4 sm:$0xff]   ;;  %v126_v58 = vld [vmem:[#allocation5 + $0x198] sm:$0xff] }
  0x49   :  { %240 = vmatprep.subr.mxu1 %v766_v0  ;;  %507 = vmatpush3.msra.mxu0 %v82_v28  ;;  %v307_v55 = vld [vmem:[#allocation8 + $0x78] sm:$0xff]  ;;  %v305_v59 = vld [vmem:[#allocation8 + $0x68] sm:$0xff]  ;;  %v304_v61 = vld [vmem:[#allocation8 + $0x60] sm:$0xff] }
  0x4a   :  { %241 = vmatpush1.msra.mxu1 %v113_v27  ;;  %508 = vmatprep.subr.mxu0 %v97_v29  ;;  %v127_v56 = vld [vmem:[#allocation5 + $0x1a0] sm:$0xff]  ;;  %v125_v60 = vld [vmem:[#allocation5 + $0x190] sm:$0xff]  ;;  %v124_v62 = vld [vmem:[#allocation5 + $0x188] sm:$0xff] }
  0x4b   :  { %242 = vmatprep.subr.mxu1 %v766_v0  ;;  %509 = vmatpush3.msra.mxu0 %v81_v31  ;;  %v303_v63 = vld [vmem:[#allocation8 + $0x58] sm:$0xff]  ;;  %v645_v2 = vld [vmem:[#allocation2 + $0x8] ss:$16 sps:$4 sm:$0xff]   ;;  %v301_v4 = vld [vmem:[#allocation8 + $0x48] sm:$0xff] }
  0x4c   :  { %243 = vmatpush1.msra.mxu1 %v112_v30  ;;  %510 = vmatprep.subr.mxu0 %v96_v33  ;;  %v123_v1 = vld [vmem:[#allocation5 + $0x180] sm:$0xff]  ;;  %v302_v3 = vld [vmem:[#allocation8 + $0x50] sm:$0xff]  ;;  %v300_v5 = vld [vmem:[#allocation8 + $0x40] sm:$0xff] }
  0x4d   :  { %244 = vmatprep.subr.mxu1 %v766_v0  ;;  %511 = vmatpush3.msra.mxu0 %v80_v34  ;;  %v299_v6 = vld [vmem:[#allocation8 + $0x38] sm:$0xff]  ;;  %v298_v7 = vld [vmem:[#allocation8 + $0x30] sm:$0xff]  ;;  %v297_v8 = vld [vmem:[#allocation8 + $0x28] sm:$0xff] }
  0x4e   :  { %245 = vmatpush1.msra.mxu1 %v111_v32  ;;  %512 = vmatprep.subr.mxu0 %v95_v35  ;;  %v296_v9 = vld [vmem:[#allocation8 + $0x20] sm:$0xff]  ;;  %v295_v10 = vld [vmem:[#allocation8 + $0x18] sm:$0xff]  ;;  %v294_v11 = vld [vmem:[#allocation8 + $0x10] sm:$0xff] }
  0x4f   :  { %246 = vmatprep.subr.mxu1 %v766_v0  ;;  %513 = vmatpush3.msra.mxu0 %v79_v37  ;;  %v293_v12 = vld [vmem:[#allocation8 + $0x8] sm:$0xff]  ;;  %v292_v13 = vld [vmem:[#allocation8] sm:$0xff]  ;;  %v486_v17 = vld [vmem:[#allocation7] ss:$0 sm:$0xff] }
  0x50   :  { %247 = vmatpush1.msra.mxu1 %v110_v36  ;;  %514 = vmatprep.subr.mxu0 %v94_v38  ;;  %v488_v32 = vld [vmem:[#allocation7 + $0x1] ss:$0 sm:$0xff]  ;;  %v489_v34 = vld [vmem:[#allocation7 + $0x2] ss:$0 sm:$0xff] }
  0x51   :  { %248 = vmatprep.subr.mxu1 %v766_v0  ;;  %515 = vmatpush3.msra.mxu0 %v78_v40 }
  0x52   :  { %249 = vmatpush1.msra.mxu1 %v109_v39  ;;  %516 = vmatprep.subr.mxu0 %v93_v41 }
  0x53   :  { %250 = vmatprep.subr.mxu1 %v766_v0  ;;  %517 = vmatpush3.msra.mxu0 %v77_v43 }
  0x54   :  { %251 = vmatpush1.msra.mxu1 %v108_v42  ;;  %518 = vmatprep.subr.mxu0 %v92_v44 }
  0x55   :  { %252 = vmatprep.subr.mxu1 %v766_v0  ;;  %519 = vmatpush3.msra.mxu0 %v76_v46 }
  0x56   :  { %253 = vmatpush1.msra.mxu1 %v107_v45  ;;  %520 = vmatprep.subr.mxu0 %v91_v47 }
  0x57   :  { %270 = vmatprep.subr.mxu1 %v766_v0  ;;  %521 = vmatpush3.msra.mxu0 %v75_v49 }
  0x58   :  { %271 = vmatpush2.msra.mxu1 %v130_v48  ;;  %216 = vmatprep.mubr.f32.mxu0 %v644_v50 }
  0x59   :  { %272 = vmatprep.subr.mxu1 %v766_v0  ;;  %217 = vmatmul.mubr.f32.vlgmr.msra.gmra.mxu0 %v642_v51 }
  0x5a   :  { %273 = vmatpush2.msra.mxu1 %v129_v52  ;;  %487 = vmatprep.mubr.msk.f32.mxu1 %vm149_vm0, %v647_v53 }
  0x5b   :  { %274 = vmatprep.subr.mxu1 %v766_v0  ;;  %559 = vmatprep.subr.mxu0 %v766_v0 }
  0x5c   :  { %275 = vmatpush2.msra.mxu1 %v128_v54  ;;  %560 = vmatpush3.msra.mxu0 %v307_v55 }
  0x5d   :  { %276 = vmatprep.subr.mxu1 %v766_v0  ;;  %561 = vmatprep.subr.mxu0 %v766_v0 }
  0x5e   :  { %277 = vmatpush2.msra.mxu1 %v127_v56  ;;  %562 = vmatpush3.msra.mxu0 %v306_v57 }
  0x5f   :  { %278 = vmatprep.subr.mxu1 %v766_v0  ;;  %563 = vmatprep.subr.mxu0 %v766_v0 }
  0x60   :  { %279 = vmatpush2.msra.mxu1 %v126_v58  ;;  %564 = vmatpush3.msra.mxu0 %v305_v59 }
  0x61   :  { %280 = vmatprep.subr.mxu1 %v766_v0  ;;  %565 = vmatprep.subr.mxu0 %v766_v0 }
  0x62   :  { %281 = vmatpush2.msra.mxu1 %v125_v60  ;;  %566 = vmatpush3.msra.mxu0 %v304_v61 }
  0x63   :  { %282 = vmatprep.subr.mxu1 %v766_v0  ;;  %567 = vmatprep.subr.mxu0 %v766_v0 }
  0x64   :  { %283 = vmatpush2.msra.mxu1 %v124_v62  ;;  %568 = vmatpush3.msra.mxu0 %v303_v63 }
  0x65   :  { %284 = vmatprep.subr.mxu1 %v766_v0  ;;  %569 = vmatprep.subr.mxu0 %v766_v0 }
  0x66   :  { %285 = vmatpush2.msra.mxu1 %v123_v1  ;;  %570 = vmatpush3.msra.mxu0 %v302_v3 }
  0x67   :  { %287 = vmatmul.mubr.f32.vlgmr.msra.gmra.mxu1 %v645_v2  ;;  %594 = vmatprep.subr.mxu1 %v766_v0 }
  0x68   :  { %595 = vmatpush3.msra.mxu1 %v307_v55  ;;  %571 = vmatprep.subr.mxu0 %v766_v0 }
  0x69   :  { %596 = vmatprep.subr.mxu1 %v766_v0  ;;  %572 = vmatpush3.msra.mxu0 %v301_v4 }
  0x6a   :  { %597 = vmatpush3.msra.mxu1 %v306_v57  ;;  %573 = vmatprep.subr.mxu0 %v766_v0 }
  0x6b   :  { %598 = vmatprep.subr.mxu1 %v766_v0  ;;  %574 = vmatpush3.msra.mxu0 %v300_v5 }
  0x6c   :  { %599 = vmatpush3.msra.mxu1 %v305_v59  ;;  %575 = vmatprep.subr.mxu0 %v766_v0 }
  0x6d   :  { %600 = vmatprep.subr.mxu1 %v766_v0  ;;  %576 = vmatpush3.msra.mxu0 %v299_v6 }
  0x6e   :  { %601 = vmatpush3.msra.mxu1 %v304_v61  ;;  %577 = vmatprep.subr.mxu0 %v766_v0 }
  0x6f   :  { %602 = vmatprep.subr.mxu1 %v766_v0  ;;  %578 = vmatpush3.msra.mxu0 %v298_v7 }
  0x70   :  { %603 = vmatpush3.msra.mxu1 %v303_v63  ;;  %579 = vmatprep.subr.mxu0 %v766_v0 }
  0x71   :  { %604 = vmatprep.subr.mxu1 %v766_v0  ;;  %580 = vmatpush3.msra.mxu0 %v297_v8 }
  0x72   :  { %605 = vmatpush3.msra.mxu1 %v302_v3  ;;  %581 = vmatprep.subr.mxu0 %v766_v0 }
  0x73   :  { %606 = vmatprep.subr.mxu1 %v766_v0  ;;  %582 = vmatpush3.msra.mxu0 %v296_v9 }
  0x74   :  { %607 = vmatpush3.msra.mxu1 %v301_v4  ;;  %583 = vmatprep.subr.mxu0 %v766_v0 }
  0x75   :  { %608 = vmatprep.subr.mxu1 %v766_v0  ;;  %584 = vmatpush3.msra.mxu0 %v295_v10 }
  0x76   :  { %609 = vmatpush3.msra.mxu1 %v300_v5  ;;  %585 = vmatprep.subr.mxu0 %v766_v0 }
  0x77   :  { %610 = vmatprep.subr.mxu1 %v766_v0  ;;  %586 = vmatpush3.msra.mxu0 %v294_v11 }
  0x78   :  { %611 = vmatpush3.msra.mxu1 %v299_v6  ;;  %587 = vmatprep.subr.mxu0 %v766_v0 }
  0x79   :  { %612 = vmatprep.subr.mxu1 %v766_v0  ;;  %588 = vmatpush3.msra.mxu0 %v293_v12 }
  0x7a   :  { %613 = vmatpush3.msra.mxu1 %v298_v7  ;;  %589 = vmatprep.subr.mxu0 %v766_v0 }
  0x7b   :  { %614 = vmatprep.subr.mxu1 %v766_v0  ;;  %590 = vmatpush3.msra.mxu0 %v292_v13 }
  0x7c   :  { %615 = vmatpush3.msra.mxu1 %v297_v8  ;;  %591 = vmatprep.mubr.msk.f32.mxu0 %vm767_vm1, %v766_v0 }
  0x7d   :  { %616 = vmatprep.subr.mxu1 %v766_v0  ;;  %626 = vmatprep.mubr.msk.f32.mxu1 %vm767_vm1, %v766_v0 }
  0x7e   :  { %617 = vmatpush3.msra.mxu1 %v296_v9 }
  0x7f   :  { %618 = vmatprep.subr.mxu1 %v766_v0 }
  0x80   :  { %619 = vmatpush3.msra.mxu1 %v295_v10 }
  0x81   :  { %620 = vmatprep.subr.mxu1 %v766_v0 }
  0x82   :  { %621 = vmatpush3.msra.mxu1 %v294_v11 }
  0x83   :  { %622 = vmatprep.subr.mxu1 %v766_v0 }
  0x84   :  { %623 = vmatpush3.msra.mxu1 %v293_v12 }
  0x85   :  { %624 = vmatprep.subr.mxu1 %v766_v0 }
  0x86   :  { %625 = vmatpush3.msra.mxu1 %v292_v13 }
 0x119   :  { %v522_v14 = vpop.f32.mrf.mxu0 }
 0x11b   :  { %v523_v15 = vpop.f32.mrf.mxu0 }
 0x11c   :  { %v524_v16 = vadd.f32 %v523_v15, %v522_v14 }
 0x11e   :  { %v219_v18 = vadd.f32 %v524_v16, %v486_v17 }
 0x127   :  { %v288_v19 = vpop.f32.mrf.mxu1 }
 0x128   :  { %v289_v20 = vadd.f32 %v288_v19, %v219_v18 }
 0x129   :  { %v290_v21 = vpop.f32.mrf.mxu1 }
 0x12a   :  { %v308_v22 = vmul.f32 %v289_v20, %v289_v20  ;;  %592 = vmatmul.mubr.f32.vlgmr.msra.gmra.mxu0 %v289_v20 }
 0x12c   :  { %627 = vmatmul.mubr.f32.vlgmr.msra.gmra.mxu1 %v308_v22 }
 0x1ea   :  { %v375_v23 = vpop.f32.mrf.mxu0 }
 0x1eb   :  { %v449_v24 = vmul.f32 %v375_v23, %v375_v23  ;;  %v452_v0 = vsub.f32 %v289_v20, %v375_v23 }
 0x1ec   :  { %v593_v25 = vpop.f32.mrf.mxu0  ;;  %v445_v26 = vpop.f32.mrf.mxu1 }
 0x1ed   :  { %v450_v27 = vsub.f32 %v445_v26, %v449_v24 }
 0x1ee   :  { %v628_v28 = vpop.f32.mrf.mxu1 }
 0x1ef   :  { %v451_v29 = vmax.f32 %v450_v27, 0.0 }
 0x1f1   :  { %v453_v30 = vadd.f32 1e-05, %v451_v29 }
 0x1f3   :  { %648 = vrsqrt.f32 %v453_v30 }
 0x200   :  { %v649_v31 = vpop.eup %648 }
 0x201   :  { %v455_v33 = vmul.f32 %v649_v31, %v452_v0 }
 0x203   :  { %v460_v35 = vmul.f32 %v488_v32, %v455_v33 }
 0x205   :  { %v465_v36 = vadd.f32 %v489_v34, %v460_v35 }
 0x207   :  { %466 = vst [vmem:[#allocation10] sm:$0xff] %v465_v36 }
 0x208   :  { %471 = vsyncadd [#allocation4], 64  ;;  %s768_s2 = smov [#allocation10]  }
 0x209   :  { %s472_s3 = sshll.u32 %s768_s2, 4  ;;  %s473_s3 = int_to_ptr.vmem [resolvable:$true] %s472_s3 }
 0x20a   :  { %s730_s12 = scalar_lea.vmem %s473_s3, 64  ;;  %s734_s13 = scalar_lea.vmem %s473_s3, 128 }
 0x20b   :  { %p731_p6 = scmp.ne.s32.totalorder %s473_s3, %s730_s12  ;;  %p735_p7 = scmp.lt.s32.totalorder %s473_s3, %s473_s3 }
 0x20c   :  { %p736_p8 = scmp.lt.s32.totalorder %s734_s13, %s730_s12 }
 0x20e   :  { %p737_p9 = por %p736_p8, %p735_p7 }
 0x210   :  { %p738_p10 = pnand %p737_p9, %p731_p6 }
 0x212   :  { %741 = shalt.err (!%p738_p10)
}
 0x213   :  { %s769_s14 = smov 64   ;;  %s770_s15 = smov 4  }
 0x214   :  { %478 = dma.vmem_to_hbm [thread:$0]  %s473_s3, 64, %s879_s4, [#allocation4], %s769_s14, %s769_s14, %s770_s15  }
 0x215   :  { %756 = dma.done.wait [#allocation4], 128  }
 0x216   :  { %757 = vsyncadd [#allocation4], 4294967168 }
 0x217   :  { %482 = vsyncpa [#allocation3], 1 }
 0x218   :  { %483 = vsyncpa [#allocation6], 1 }
 0x219   :  { %484 = vsyncpa [#allocation9], 1 }
 0x21a   :  { %485 = vsyncpa [#allocation4], 1 }

</bundles_post_ra>
